<compile_context>
chip_gen: v7x
topology: tpu7x:2x2x1
jax: 0.10.0
libtpu: 0.0.40
codegen_flags: <defaults>
</compile_context>

<pallas_src>
import jax
import jax.numpy as jnp
from jax.experimental import pallas as pl
from jax.experimental.pallas import tpu as pltpu


def _round_up(x: int, m: int) -> int:
    return ((x + m - 1) // m) * m


def _cdiv(a: int, b: int) -> int:
    return (a + b - 1) // b


def _linear_kernel(x_ref, w_ref, b_ref, o_ref):
    k = pl.program_id(2)

    @pl.when(k == 0)
    def _init():
        o_ref[...] = jnp.zeros_like(o_ref)

    # MXU matmul with f32 accumulation directly into the (K-resident) output tile.
    o_ref[...] += jnp.dot(
        x_ref[...], w_ref[...], preferred_element_type=jnp.float32
    )

    @pl.when(k == pl.num_programs(2) - 1)
    def _finalize():
        # Bias added exactly once, on the final K step (broadcast over rows).
        o_ref[...] += b_ref[...]


def _choose_tile(dim: int, cap: int, align: int) -> int:
    if dim >= cap:
        return cap
    if dim <= align:
        return dim  # block == full array dim is always a legal block shape
    return _round_up(dim, align)


def _vmem_cap_bytes() -> int:
    try:
        phys = pltpu.get_tpu_info().vmem_capacity_bytes
    except Exception:
        phys = 64 * 1024 * 1024  # conservative (v7x per-core VMEM)
    return (3 * phys) // 4  # ~48 MiB on v7x, ~96 MiB on v5e/v6e


def my_linear(x, W, b, *, tm=None, tn=None, tk=None, compute_dtype=None):
    """Pallas equivalent of MyLinear.forward: y = x @ W + b.

    x: [M, K] float32, W: [K, N] float32, b: [N] float32 -> [M, N] float32.
    compute_dtype=jnp.bfloat16 optionally runs the MXU at its native input
    dtype (f32 accumulation is preserved).
    """
    M, K = x.shape
    K2, N = W.shape
    assert K == K2, (K, K2)
    assert b.shape == (N,), b.shape

    if compute_dtype is not None:
        x_in = x.astype(compute_dtype)
        W_in = W.astype(compute_dtype)
    else:
        x_in, W_in = x, W
    itemsize = jnp.dtype(x_in.dtype).itemsize
    sub_align = max(8, 32 // itemsize)  # 8 sublanes for f32, 16 for bf16

    # ---- tile selection: large, MXU/lane aligned ------------------------
    auto_tm = tm is None
    tm = tm if tm is not None else _choose_tile(M, 512, sub_align)
    tn = tn if tn is not None else _choose_tile(N, 512, 128)

    Kp = _round_up(K, 128)
    if tk is None:
        # Largest multiple of 128 that divides Kp, capped at 1024 (no over-pad).
        units = Kp // 128
        best = 1
        for d in range(1, min(units, 8) + 1):
            if units % d == 0:
                best = d
        tk = best * 128
    if Kp % tk:
        Kp = _round_up(Kp, tk)

    grid_m, grid_n = _cdiv(M, tm), _cdiv(N, tn)
    # v7x has 2 TensorCores: avoid a 1x1 parallel grid when M allows a split.
    if auto_tm and grid_m * grid_n == 1 and M >= 2 * sub_align:
        tm = _round_up(_cdiv(M, 2), sub_align)
        grid_m = _cdiv(M, tm)
    grid_k = Kp // tk
    grid = (grid_m, grid_n, grid_k)

    # ---- only K is zero-padded (neutral for the matmul) -----------------
    if Kp != K:
        x_in = jnp.pad(x_in, ((0, 0), (0, Kp - K)))
        W_in = jnp.pad(W_in, ((0, Kp - K), (0, 0)))
    b2d = b.reshape(1, N)

    # ---- VMEM budget: true double-buffered footprint + 25% headroom -----
    foot = (2 * tm * tk * itemsize + 2 * tk * tn * itemsize
            + 2 * tn * 4 + 2 * tm * tn * 4)
    vmem_limit = int(min(max(int(foot * 1.25), 32 * 1024 * 1024),
                         _vmem_cap_bytes()))

    cost = pl.CostEstimate(
        flops=int(2 * M * N * Kp),
        transcendentals=0,
        bytes_accessed=int(
            itemsize * (M * Kp * grid_n + Kp * N * grid_m) + 4 * (N + M * N)
        ),
    )

    return pl.pallas_call(
        _linear_kernel,
        out_shape=jax.ShapeDtypeStruct((M, N), jnp.float32),
        grid_spec=pltpu.PrefetchScalarGridSpec(
            num_scalar_prefetch=0,
            grid=grid,
            in_specs=[
                pl.BlockSpec((tm, tk), lambda i, j, k: (i, k)),
                pl.BlockSpec((tk, tn), lambda i, j, k: (k, j)),
                pl.BlockSpec((1, tn), lambda i, j, k: (0, j)),
            ],
            out_specs=pl.BlockSpec((tm, tn), lambda i, j, k: (i, j)),
        ),
        compiler_params=pltpu.CompilerParams(
            dimension_semantics=("parallel", "parallel", "arbitrary"),
            vmem_limit_bytes=vmem_limit,
        ),
        cost_estimate=cost,
    )(x_in, W_in, b2d)


if __name__ == "__main__":
    # ---- Test 1: exact values from the reference PyTorch script (4x3 @ 3x2). ----
    x = jnp.array(
        [[1.0, 1.0, 1.0],
         [2.0, 2.0, 2.0],
         [3.0, 3.0, 3.0],
         [4.0, 4.0, 4.0]],
        dtype=jnp.float32,
    )
    W = jnp.array([[1.0, 2.0], [3.0, 4.0], [5.0, 6.0]], dtype=jnp.float32)
    b = jnp.array([2.0, 2.0], dtype=jnp.float32)

    y = my_linear(x, W, b)
    jax.block_until_ready(y)
    y_ref = x @ W + b
    assert y.shape == (4, 2)
    assert jnp.allclose(y, y_ref, atol=1e-5), (y, y_ref)

    # ---- Test 2: random MyLinear at a size exercising the tiled 3D grid, ----
    # ---- partial edge tiles (no M/N padding), and a multi-step K reduction. ----
    key = jax.random.PRNGKey(0)
    kx, kw, kb = jax.random.split(key, 3)
    M2, K2, N2 = 200, 384, 160  # non-multiples of 128: edge-tile masking path
    x2 = jax.random.normal(kx, (M2, K2), dtype=jnp.float32)
    W2 = jax.random.normal(kw, (K2, N2), dtype=jnp.float32) * 0.05
    b2 = jax.random.normal(kb, (N2,), dtype=jnp.float32)
    y2_ref = x2 @ W2 + b2

    # Explicit small tiles: 2x2 parallel grid + 3-step K accumulation-into-output.
    y2 = my_linear(x2, W2, b2, tm=128, tn=128, tk=128)
    jax.block_until_ready(y2)
    assert y2.shape == (M2, N2)
    assert jnp.allclose(y2, y2_ref, atol=1e-3, rtol=1e-3), (
        jnp.max(jnp.abs(y2 - y2_ref))
    )

    # Default (auto) tiles: single large K tile, M split so parallel grid >= 2.
    y3 = my_linear(x2, W2, b2)
    jax.block_until_ready(y3)
    assert jnp.allclose(y3, y2_ref, atol=1e-3, rtol=1e-3), (
        jnp.max(jnp.abs(y3 - y2_ref))
    )

    # ---- Test 3: bf16 operands (native MXU input dtype), f32 accumulation. ----
    y4 = my_linear(x2, W2, b2, compute_dtype=jnp.bfloat16)
    jax.block_until_ready(y4)
    assert jnp.allclose(y4, y2_ref, atol=5e-2, rtol=5e-2), (
        jnp.max(jnp.abs(y4 - y2_ref))
    )

    print("KERNEL_OK")
</pallas_src>

<mosaic_0001>
module attributes {stable_mosaic.version = 11 : i64} {
  func.func @_linear_kernel(%arg0: i32, %arg1: i32, %arg2: i32, %arg3: memref<4x128xf32, #tpu.memory_space<vmem>>, %arg4: memref<128x2xf32, #tpu.memory_space<vmem>>, %arg5: memref<1x2xf32, #tpu.memory_space<vmem>>, %arg6: memref<4x2xf32, #tpu.memory_space<vmem>>) attributes {dimension_semantics = [#tpu.dimension_semantics<parallel>, #tpu.dimension_semantics<parallel>, #tpu.dimension_semantics<arbitrary>], iteration_bounds = array<i64: 1, 1, 1>, scalar_prefetch = 0 : i64, scratch_operands = 0 : i64, tpu.core_type = #tpu.core_type<tc>, window_params = [{transform_indices = @transform_0, window_bounds = array<i64: 4, 128>}, {transform_indices = @transform_1, window_bounds = array<i64: 128, 2>}, {transform_indices = @transform_2, window_bounds = array<i64: 1, 2>}, {transform_indices = @transform_3, window_bounds = array<i64: 4, 2>}]} {
    %c0_i32 = arith.constant 0 : i32
    %0 = arith.cmpi eq, %arg2, %c0_i32 : i32
    %1 = arith.extui %0 : i1 to i32
    %c0_i32_0 = arith.constant 0 : i32
    %2 = arith.cmpi ne, %1, %c0_i32_0 : i32
    scf.if %2 {
      %cst_10 = arith.constant 0.000000e+00 : f32
      %12 = vector.broadcast %cst_10 : f32 to vector<4x2xf32>
      %c0_11 = arith.constant 0 : index
      %c0_12 = arith.constant 0 : index
      %13 = vector.load %arg6[%c0_11, %c0_12] : memref<4x2xf32, #tpu.memory_space<vmem>>, vector<4x2xf32>
      tpu.vector_store %arg6[%c0_11, %c0_12], %12 {strides = array<i32>} : memref<4x2xf32, #tpu.memory_space<vmem>>, vector<4x2xf32>,
    } else {
    }
    %c0 = arith.constant 0 : index
    %c0_1 = arith.constant 0 : index
    %3 = vector.load %arg6[%c0, %c0_1] : memref<4x2xf32, #tpu.memory_space<vmem>>, vector<4x2xf32>
    %c0_2 = arith.constant 0 : index
    %c0_3 = arith.constant 0 : index
    %4 = vector.load %arg3[%c0_2, %c0_3] : memref<4x128xf32, #tpu.memory_space<vmem>>, vector<4x128xf32>
    %c0_4 = arith.constant 0 : index
    %c0_5 = arith.constant 0 : index
    %5 = vector.load %arg4[%c0_4, %c0_5] : memref<128x2xf32, #tpu.memory_space<vmem>>, vector<128x2xf32>
    %cst = arith.constant dense<0.000000e+00> : vector<4x2xf32>
    %6 = tpu.matmul %4, %5, %cst {dimension_numbers = #tpu.dot_dimension_numbers<[1], [0], [0], [1], [0, 0, 1, 1], [], []>} : vector<4x128xf32>, vector<128x2xf32>, vector<4x2xf32> -> vector<4x2xf32>
    %7 = arith.addf %3, %6 : vector<4x2xf32>
    %c0_6 = arith.constant 0 : index
    %c0_7 = arith.constant 0 : index
    %8 = vector.load %arg6[%c0_6, %c0_7] : memref<4x2xf32, #tpu.memory_space<vmem>>, vector<4x2xf32>
    tpu.vector_store %arg6[%c0_6, %c0_7], %7 {strides = array<i32>} : memref<4x2xf32, #tpu.memory_space<vmem>>, vector<4x2xf32>,
    %c0_i32_8 = arith.constant 0 : i32
    %9 = arith.cmpi eq, %arg2, %c0_i32_8 : i32
    %10 = arith.extui %9 : i1 to i32
    %c0_i32_9 = arith.constant 0 : i32
    %11 = arith.cmpi ne, %10, %c0_i32_9 : i32
    scf.if %11 {
      %c0_10 = arith.constant 0 : index
      %c0_11 = arith.constant 0 : index
      %12 = vector.load %arg6[%c0_10, %c0_11] : memref<4x2xf32, #tpu.memory_space<vmem>>, vector<4x2xf32>
      %c0_12 = arith.constant 0 : index
      %c0_13 = arith.constant 0 : index
      %13 = vector.load %arg5[%c0_12, %c0_13] : memref<1x2xf32, #tpu.memory_space<vmem>>, vector<1x2xf32>
      %14 = vector.broadcast %13 : vector<1x2xf32> to vector<4x2xf32>
      %15 = arith.addf %12, %14 : vector<4x2xf32>
      %c0_14 = arith.constant 0 : index
      %c0_15 = arith.constant 0 : index
      %16 = vector.load %arg6[%c0_14, %c0_15] : memref<4x2xf32, #tpu.memory_space<vmem>>, vector<4x2xf32>
      tpu.vector_store %arg6[%c0_14, %c0_15], %15 {strides = array<i32>} : memref<4x2xf32, #tpu.memory_space<vmem>>, vector<4x2xf32>,
    } else {
    }
    return
  }
  func.func @transform_0(%arg0: i32, %arg1: i32, %arg2: i32) -> (i32, i32) {
    %c0_i32 = arith.constant 0 : i32
    return %arg0, %arg2 : i32, i32
  }
  func.func @transform_1(%arg0: i32, %arg1: i32, %arg2: i32) -> (i32, i32) {
    %c0_i32 = arith.constant 0 : i32
    return %arg2, %arg1 : i32, i32
  }
  func.func @transform_2(%arg0: i32, %arg1: i32, %arg2: i32) -> (i32, i32) {
    %c0_i32 = arith.constant 0 : i32
    %c0_i32_0 = arith.constant 0 : i32
    return %c0_i32, %arg1 : i32, i32
  }
  func.func @transform_3(%arg0: i32, %arg1: i32, %arg2: i32) -> (i32, i32) {
    %c0_i32 = arith.constant 0 : i32
    return %arg0, %arg1 : i32, i32
  }
}

</mosaic_0001>

<bundles_post_ra>
// kernel: tpu_custom_call.1
= control target key start
LH: loop header
LB: loop body
LE: loop exit
PB: predicated region body
PF: predicated region fallthrough
CT: control target
= control target key end

     0   :  { %vm18_vm0 = vcmask 11264   ;;  %v208_v0 = vmov 0.0|0.0   ;;  %v209_v4 = vmov 0.0   ;;  %vm210_vm1 = vmmov 0   ;;  %s303_s1 = inlined_call_operand.vmem [shape: f32[128,2], index: 1, kind: input, shape index: {}]   ;;  %s304_s3 = inlined_call_operand.vmem [shape: f32[4,2], index: 3, kind: output, shape index: {}]   ;;  %s305_s0 = inlined_call_operand.vmem [shape: f32[4,128], index: 0, kind: input, shape index: {}]   ;;  %s306_s2 = inlined_call_operand.vmem [shape: f32[1,2], index: 2, kind: input, shape index: {}]  }
   0x1   :  { %181 = vmatprep.subr.bf16.mxu0 %v208_v0  ;;  %v22_v1 = vld [vmem:[%s303_s1] sm:$0xff]  ;;  %v23_v2 = vld [vmem:[%s303_s1 + $0x8] sm:$0xff]  ;;  %v24_v3 = vld [vmem:[%s303_s1 + $0x10] sm:$0xff]  ;;  %19 = vst.msk [vmem:[%s304_s3] sm:$0xf] %vm18_vm0, %v209_v4  ;;  %178 = vmatprep.mubr.msk.f32.mxu0 %vm210_vm1, %v209_v4 }
   0x2   :  { %v182_v5 = vpack.c.bf16 %v23_v2, %v22_v1  ;;  %v25_v6 = vld [vmem:[%s303_s1 + $0x18] sm:$0xff]  ;;  %v26_v8 = vld [vmem:[%s303_s1 + $0x20] sm:$0xff]  ;;  %v27_v9 = vld [vmem:[%s303_s1 + $0x28] sm:$0xff] }
   0x3   :  { %v185_v7 = vpack.c.bf16 %v25_v6, %v24_v3  ;;  %v188_v10 = vpack.c.bf16 %v27_v9, %v26_v8  ;;  %v28_v11 = vld [vmem:[%s303_s1 + $0x30] sm:$0xff]  ;;  %v29_v12 = vld [vmem:[%s303_s1 + $0x38] sm:$0xff]  ;;  %v30_v14 = vld [vmem:[%s303_s1 + $0x40] sm:$0xff] }
   0x4   :  { %183 = vmatpush3.bf16.msra.mxu0 %v182_v5  ;;  %v191_v13 = vpack.c.bf16 %v29_v12, %v28_v11  ;;  %v31_v15 = vld [vmem:[%s303_s1 + $0x48] sm:$0xff]  ;;  %v32_v17 = vld [vmem:[%s303_s1 + $0x50] sm:$0xff]  ;;  %v33_v18 = vld [vmem:[%s303_s1 + $0x58] sm:$0xff] }
   0x5   :  { %184 = vmatprep.subr.bf16.mxu0 %v208_v0  ;;  %v194_v16 = vpack.c.bf16 %v31_v15, %v30_v14  ;;  %v197_v19 = vpack.c.bf16 %v33_v18, %v32_v17  ;;  %v34_v20 = vld [vmem:[%s303_s1 + $0x60] sm:$0xff]  ;;  %v35_v21 = vld [vmem:[%s303_s1 + $0x68] sm:$0xff]  ;;  %v36_v23 = vld [vmem:[%s303_s1 + $0x70] sm:$0xff] }
   0x6   :  { %v200_v22 = vpack.c.bf16 %v35_v21, %v34_v20  ;;  %v37_v24 = vld [vmem:[%s303_s1 + $0x78] sm:$0xff]  ;;  %v21_v26 = vld [vmem:[%s305_s0] sm:$0xf] }
   0x7   :  { %v203_v25 = vpack.c.bf16 %v37_v24, %v36_v23  ;;  %v128_v31 = vld [vmem:[%s306_s2] ss:$0 sm:$0xff] }
   0x8   :  { %186 = vmatpush3.bf16.msra.mxu0 %v185_v7  ;;  %v20_v27 = vld [vmem:[%s304_s3] sm:$0xf] }
   0x9   :  { %187 = vmatprep.subr.bf16.mxu0 %v208_v0 }
   0xc   :  { %189 = vmatpush3.bf16.msra.mxu0 %v188_v10 }
   0xd   :  { %190 = vmatprep.subr.bf16.mxu0 %v208_v0 }
  0x10   :  { %192 = vmatpush3.bf16.msra.mxu0 %v191_v13 }
  0x11   :  { %193 = vmatprep.subr.bf16.mxu0 %v208_v0 }
  0x14   :  { %195 = vmatpush3.bf16.msra.mxu0 %v194_v16 }
  0x15   :  { %196 = vmatprep.subr.bf16.mxu0 %v208_v0 }
  0x18   :  { %198 = vmatpush3.bf16.msra.mxu0 %v197_v19 }
  0x19   :  { %199 = vmatprep.subr.bf16.mxu0 %v208_v0 }
  0x1c   :  { %201 = vmatpush3.bf16.msra.mxu0 %v200_v22 }
  0x1d   :  { %202 = vmatprep.subr.bf16.mxu0 %v208_v0 }
  0x20   :  { %204 = vmatpush3.bf16.msra.mxu0 %v203_v25 }
  0x23   :  { %179 = vmatmul.mubr.f32.vlgmr.msra.gmra.mrb[0].mxu0 %v21_v26 }
  0xf6   :  { %v104_v28 = vpop.f32.mrb[0].mxu0 }
  0xf7   :  { %v108_v29 = vadd.f32 %v104_v28, %v20_v27  ;;  %v180_v30 = vpop.f32.mrb[1].mxu0 }
  0xf9   :  { %110 = vst.msk [vmem:[%s304_s3] sm:$0xf] %vm18_vm0, %v108_v29 }
 0x100   :  { %v114_v32 = vld [vmem:[%s304_s3] sm:$0xf] }
 0x101   :  { %v122_v33 = vadd.f32 %v128_v31, %v114_v32 }
 0x103   :  { %123 = vst.msk [vmem:[%s304_s3] sm:$0xf] %vm18_vm0, %v122_v33 }

</bundles_post_ra>
